<compile_context>
chip_gen: v6e
topology: v6e:2x2x1
jax: 0.10.0
libtpu: 0.0.40
codegen_flags: <defaults>
</compile_context>

<pallas_src>
import jax
import jax.numpy as jnp
from jax import lax
from jax.experimental import pallas as pl
from jax.experimental.pallas import tpu as pltpu


# Contract dim 1 of lhs with dim 1 of rhs ("NT" matmul -- MXU friendly).
_CONTRACT_LAST = (((1,), (1,)), ((), ()))


def _make_state_mlp_kernel(has_b2: bool, has_bias: bool):
    """Build kernel: out[td, n_tile] = W2 @ tanh(E @ W1^T + b1)^T (+ b2) (+ bias)."""

    def kernel(*refs):
        it = iter(refs)
        e_ref = next(it)                              # (n_tile, token_dim)
        w1_ref = next(it)                             # (hidden_dim, token_dim)
        b1_ref = next(it)                             # (1, hidden_dim)
        w2_ref = next(it)                             # (token_dim, hidden_dim)
        b2_ref = next(it) if has_b2 else None         # (token_dim, 1)
        bias_ref = next(it) if has_bias else None     # (token_dim, n_tile) or (token_dim, 1)
        out_ref = next(it)                            # (token_dim, n_tile)

        # h = tanh(E @ W1^T + b1)   : (n_tile, hidden_dim)
        h = jnp.tanh(
            lax.dot_general(
                e_ref[...], w1_ref[...],
                dimension_numbers=_CONTRACT_LAST,
                preferred_element_type=jnp.float32,
            )
            + b1_ref[...]
        )
        # y^T = W2 @ h^T            : (token_dim, n_tile)
        # Transposed result comes straight off the MXU -- no XLU transpose.
        y_t = lax.dot_general(
            w2_ref[...], h,
            dimension_numbers=_CONTRACT_LAST,
            preferred_element_type=jnp.float32,
        )
        if has_b2:
            y_t = y_t + b2_ref[...]
        if has_bias:
            y_t = y_t + bias_ref[...]
        out_ref[...] = y_t.astype(out_ref.dtype)

    return kernel


def state_mlp_forward(embed_weight, w1, b1, w2, b2=None, bias=None, *, row_tile=512):
    """Pallas StateMlp.forward() (output_shape=None). Returns (token_dim, n)."""
    n, token_dim = embed_weight.shape
    hidden_dim, td_w1 = w1.shape
    assert td_w1 == token_dim, (w1.shape, token_dim)
    assert w2.shape == (token_dim, hidden_dim), w2.shape
    dtype = embed_weight.dtype
    itemsize = jnp.dtype(dtype).itemsize

    has_b2 = b2 is not None
    has_bias = bias is not None

    # Wrapper does only trivial reshapes (no broadcast_to, no synthetic zero bias).
    inputs = [embed_weight, w1, jnp.reshape(b1, (1, hidden_dim)), w2]
    if has_b2:
        inputs.append(jnp.reshape(b2, (token_dim, 1)))
    if has_bias:
        bias2d = jnp.asarray(bias, dtype)
        if bias2d.ndim == 1:
            bias2d = jnp.reshape(bias2d, (token_dim, 1))
        inputs.append(bias2d)

    kernel = _make_state_mlp_kernel(has_b2, has_bias)
    out_shape = jax.ShapeDtypeStruct((token_dim, n), dtype)

    out_bytes = token_dim * n * itemsize
    cost = pl.CostEstimate(
        flops=4 * n * token_dim * hidden_dim,               # two matmuls
        transcendentals=n * hidden_dim,                     # tanh
        bytes_accessed=int(
            sum(int(x.size) * jnp.dtype(x.dtype).itemsize for x in inputs) + out_bytes
        ),
    )

    vmem = pl.BlockSpec(memory_space=pltpu.MemorySpace.VMEM)

    if n <= row_tile:
        # Tiny / medium n: the whole problem is a handful of vregs; a single
        # VMEM-resident block (no grid) minimizes launch + DMA overhead, which
        # dominates at these shapes.
        return pl.pallas_call(
            kernel,
            out_shape=out_shape,
            in_specs=[vmem] * len(inputs),
            out_specs=vmem,
            cost_estimate=cost,
        )(*inputs)

    # Large n: tile embedding rows / output columns.  TN is a multiple of 128 so
    # output stores are unmasked (lane-dense), and the n axis is "parallel" so it
    # shards across TensorCores (v7x megacore).  Weights/biases stay VMEM-resident.
    tn = row_tile
    grid = (pl.cdiv(n, tn),)

    in_specs = [
        pl.BlockSpec((tn, token_dim), lambda i: (i, 0)),           # E tile (pipelined)
        pl.BlockSpec((hidden_dim, token_dim), lambda i: (0, 0)),   # W1 (resident)
        pl.BlockSpec((1, hidden_dim), lambda i: (0, 0)),           # b1 (resident)
        pl.BlockSpec((token_dim, hidden_dim), lambda i: (0, 0)),   # W2 (resident)
    ]
    if has_b2:
        in_specs.append(pl.BlockSpec((token_dim, 1), lambda i: (0, 0)))
    if has_bias:
        if inputs[-1].shape[-1] == 1:
            in_specs.append(pl.BlockSpec((token_dim, 1), lambda i: (0, 0)))
        else:
            in_specs.append(pl.BlockSpec((token_dim, tn), lambda i: (0, i)))
    out_spec = pl.BlockSpec((token_dim, tn), lambda i: (0, i))

    # Explicit VMEM budget: double-buffered E / out (/ bias) tiles + resident
    # weights, with headroom; capped at 32 MiB (fits v7x's 64 MiB total, and the
    # default scoped limit on all of v5e / v6e / v7x).
    resident = (int(w1.size) + int(w2.size) + hidden_dim
                + (token_dim if has_b2 else 0)) * itemsize
    n_pipelined_bufs = 3 if (has_bias and inputs[-1].shape[-1] != 1) else 2
    pipelined = 2 * tn * token_dim * itemsize * n_pipelined_bufs
    vmem_limit = int(min(32 * 1024 * 1024, 4 * (resident + pipelined) + (4 << 20)))

    return pl.pallas_call(
        kernel,
        out_shape=out_shape,
        grid_spec=pltpu.PrefetchScalarGridSpec(
            num_scalar_prefetch=0,
            grid=grid,
            in_specs=in_specs,
            out_specs=out_spec,
        ),
        compiler_params=pltpu.CompilerParams(
            dimension_semantics=("parallel",),
            vmem_limit_bytes=vmem_limit,
        ),
        cost_estimate=cost,
    )(*inputs)


def _init_params(key, n, token_dim, hidden_dim, dtype=jnp.float32, init="random"):
    """Deterministic params mimicking the PyTorch module (native PyTorch layouts)."""
    k_e, k_w1, k_b1, k_w2, k_b2 = jax.random.split(key, 5)
    embed_weight = jax.random.normal(k_e, (n, token_dim), dtype=dtype)   # nn.Embedding: N(0,1)
    lim1 = 1.0 / (token_dim ** 0.5)
    w1 = jax.random.uniform(k_w1, (hidden_dim, token_dim), dtype=dtype,
                            minval=-lim1, maxval=lim1)
    b1 = jax.random.uniform(k_b1, (hidden_dim,), dtype=dtype, minval=-lim1, maxval=lim1)
    lim2 = 1.0 / (hidden_dim ** 0.5)
    w2 = jax.random.uniform(k_w2, (token_dim, hidden_dim), dtype=dtype,
                            minval=-lim2, maxval=lim2)
    b2 = jax.random.uniform(k_b2, (token_dim,), dtype=dtype, minval=-lim2, maxval=lim2)
    if init == "zero":
        w2 = jnp.zeros_like(w2)
        b2 = jnp.zeros_like(b2)
    return embed_weight, w1, b1, w2, b2


def _reference(embed_weight, w1, b1, w2, b2=None, bias=None):
    h = jnp.tanh(embed_weight @ w1.T + b1[None, :])
    y = h @ w2.T
    if b2 is not None:
        y = y + b2[None, :]
    y = y.T
    if bias is not None:
        y = y + bias
    return y


if __name__ == "__main__":
    token_dim, hidden_dim = 32, 64
    atol = rtol = 1e-4

    # --- small n (single-block path); Linear2 has bias, no external bias ---
    n = 8
    E, w1, b1, w2, b2 = _init_params(jax.random.PRNGKey(0), n, token_dim, hidden_dim)
    out = jax.block_until_ready(state_mlp_forward(E, w1, b1, w2, b2=b2))
    ref = _reference(E, w1, b1, w2, b2=b2)
    assert out.shape == (token_dim, n), out.shape
    assert jnp.allclose(out, ref, atol=atol, rtol=rtol), float(jnp.max(jnp.abs(out - ref)))

    # --- small n with external bias (Linear2 has no bias, matching the module) ---
    bias = jax.random.normal(jax.random.PRNGKey(1), (token_dim, n), jnp.float32)
    out_b = jax.block_until_ready(state_mlp_forward(E, w1, b1, w2, b2=None, bias=bias))
    ref_b = _reference(E, w1, b1, w2, b2=None, bias=bias)
    assert jnp.allclose(out_b, ref_b, atol=atol, rtol=rtol), float(jnp.max(jnp.abs(out_b - ref_b)))

    # --- large n: gridded path (lane-dense 512-wide output tiles, parallel axis) ---
    n_big = 1024
    E2, w1b, b1b, w2b, b2b = _init_params(jax.random.PRNGKey(2), n_big, token_dim, hidden_dim)
    out2 = jax.block_until_ready(state_mlp_forward(E2, w1b, b1b, w2b, b2=b2b))
    ref2 = _reference(E2, w1b, b1b, w2b, b2=b2b)
    assert out2.shape == (token_dim, n_big), out2.shape
    assert jnp.allclose(out2, ref2, atol=atol, rtol=rtol), float(jnp.max(jnp.abs(out2 - ref2)))

    # --- large n with a full-width external bias (blocked bias BlockSpec) ---
    bias2 = jax.random.normal(jax.random.PRNGKey(3), (token_dim, n_big), jnp.float32)
    out2b = jax.block_until_ready(state_mlp_forward(E2, w1b, b1b, w2b, b2=None, bias=bias2))
    ref2b = _reference(E2, w1b, b1b, w2b, b2=None, bias=bias2)
    assert jnp.allclose(out2b, ref2b, atol=atol, rtol=rtol), float(jnp.max(jnp.abs(out2b - ref2b)))

    print("KERNEL_OK")
</pallas_src>

<mosaic_0001>
module attributes {stable_mosaic.version = 11 : i64} {
  func.func @kernel(%arg0: memref<8x32xf32, #tpu.memory_space<vmem>>, %arg1: memref<64x32xf32, #tpu.memory_space<vmem>>, %arg2: memref<1x64xf32, #tpu.memory_space<vmem>>, %arg3: memref<32x64xf32, #tpu.memory_space<vmem>>, %arg4: memref<32x1xf32, #tpu.memory_space<vmem>>, %arg5: memref<32x8xf32, #tpu.memory_space<vmem>>) attributes {dimension_semantics = [], scalar_prefetch = 0 : i64, scratch_operands = 0 : i64, tpu.core_type = #tpu.core_type<tc>} {
    %c0 = arith.constant 0 : index
    %c0_0 = arith.constant 0 : index
    %0 = vector.load %arg0[%c0, %c0_0] : memref<8x32xf32, #tpu.memory_space<vmem>>, vector<8x32xf32>
    %c0_1 = arith.constant 0 : index
    %c0_2 = arith.constant 0 : index
    %1 = vector.load %arg1[%c0_1, %c0_2] : memref<64x32xf32, #tpu.memory_space<vmem>>, vector<64x32xf32>
    %cst = arith.constant dense<0.000000e+00> : vector<8x64xf32>
    %2 = tpu.matmul %0, %1, %cst {dimension_numbers = #tpu.dot_dimension_numbers<[1], [1], [0], [0], [0, 0, 1, 0], [], []>} : vector<8x32xf32>, vector<64x32xf32>, vector<8x64xf32> -> vector<8x64xf32>
    %c0_3 = arith.constant 0 : index
    %c0_4 = arith.constant 0 : index
    %3 = vector.load %arg2[%c0_3, %c0_4] : memref<1x64xf32, #tpu.memory_space<vmem>>, vector<1x64xf32>
    %4 = vector.broadcast %3 : vector<1x64xf32> to vector<8x64xf32>
    %5 = arith.addf %2, %4 : vector<8x64xf32>
    %6 = math.tanh %5 : vector<8x64xf32>
    %c0_5 = arith.constant 0 : index
    %c0_6 = arith.constant 0 : index
    %7 = vector.load %arg3[%c0_5, %c0_6] : memref<32x64xf32, #tpu.memory_space<vmem>>, vector<32x64xf32>
    %cst_7 = arith.constant dense<0.000000e+00> : vector<32x8xf32>
    %8 = tpu.matmul %7, %6, %cst_7 {dimension_numbers = #tpu.dot_dimension_numbers<[1], [1], [0], [0], [0, 0, 1, 0], [], []>} : vector<32x64xf32>, vector<8x64xf32>, vector<32x8xf32> -> vector<32x8xf32>
    %c0_8 = arith.constant 0 : index
    %c0_9 = arith.constant 0 : index
    %9 = vector.load %arg4[%c0_8, %c0_9] : memref<32x1xf32, #tpu.memory_space<vmem>>, vector<32x1xf32>
    %10 = vector.broadcast %9 : vector<32x1xf32> to vector<32x8xf32>
    %11 = arith.addf %8, %10 : vector<32x8xf32>
    %c0_10 = arith.constant 0 : index
    %c0_11 = arith.constant 0 : index
    %12 = vector.load %arg5[%c0_10, %c0_11] : memref<32x8xf32, #tpu.memory_space<vmem>>, vector<32x8xf32>
    tpu.vector_store %arg5[%c0_10, %c0_11], %11 {strides = array<i32>} : memref<32x8xf32, #tpu.memory_space<vmem>>, vector<32x8xf32>,
    return
  }
}

</mosaic_0001>

<bundles_post_ra>
// kernel: tpu_custom_call.1
= control target key start
LH: loop header
LB: loop body
LE: loop exit
PB: predicated region body
PF: predicated region fallthrough
CT: control target
= control target key end

     0   :  { %vm36_vm0 = vcmask 261120   ;;  %v336_v0 = vmov 0.0   ;;  %vm337_vm1 = vmmov 0   ;;  %vm163_vm2 = vcmask 523264   ;;  %s450_s1 = inlined_call_operand.vmem [shape: f32[64,32], index: 1, kind: input, shape index: {}]   ;;  %s451_s0 = inlined_call_operand.vmem [shape: f32[8,32], index: 0, kind: input, shape index: {}]   ;;  %s452_s3 = inlined_call_operand.vmem [shape: f32[32,64], index: 3, kind: input, shape index: {}]   ;;  %s453_s4 = inlined_call_operand.vmem [shape: f32[32,1], index: 4, kind: input, shape index: {}]   ;;  %s454_s2 = inlined_call_operand.vmem [shape: f32[1,64], index: 2, kind: input, shape index: {}]   ;;  %s455_s5 = inlined_call_operand.vmem [shape: f32[32,8], index: 5, kind: output, shape index: {}]  }
   0x1   :  { %302 = vmatprep.subr.mxu0 %v336_v0  ;;  %v28_v1 = vld [vmem:[%s450_s1 + $0x38] sm:$0xff]  ;;  %318 = vmatprep.mubr.msk.f32.mxu0 %vm337_vm1, %v336_v0  ;;  %v27_v2 = vld [vmem:[%s450_s1 + $0x30] sm:$0xff]  ;;  %v26_v3 = vld [vmem:[%s450_s1 + $0x28] sm:$0xff]  ;;  %v338_v11 = vmov 0   ;;  %vm264_vm3 = vcmask 64512  }
   0x2   :  { %303 = vmatpush3.xpose.msk.msra.mxu0 %vm36_vm0, %v28_v1  ;;  %v25_v4 = vld [vmem:[%s450_s1 + $0x20] sm:$0xff]  ;;  %v24_v5 = vld [vmem:[%s450_s1 + $0x18] sm:$0xff]  ;;  %v23_v6 = vld [vmem:[%s450_s1 + $0x10] sm:$0xff]  ;;  %332 = vset.pattern.permute.xlu0 %v338_v11 }
   0x3   :  { %304 = vmatprep.subr.mxu0 %v336_v0  ;;  %v22_v7 = vld [vmem:[%s450_s1 + $0x8] sm:$0xff]  ;;  %v21_v8 = vld [vmem:[%s450_s1] sm:$0xff]  ;;  %333 = vset.pattern.permute.xlu1 %v338_v11  ;;  %v141_v13 = vld [vmem:[%s453_s4 + $0x10] sm:$0xff] }
   0x4   :  { %v20_v9 = vld [vmem:[%s451_s0] sm:$0xff]  ;;  %155 = vperm.xlu1 %333, %v141_v13   ;;  %v140_v14 = vld [vmem:[%s453_s4 + $0x8] sm:$0xff]  ;;  %v142_v15 = vld [vmem:[%s453_s4 + $0x18] sm:$0xff] }
   0x5   :  { %v135_v10 = vld [vmem:[%s452_s3] sm:$0xff]  ;;  %v136_v21 = vld [vmem:[%s452_s3 + $0x8] sm:$0xff]  ;;  %v137_v22 = vld [vmem:[%s452_s3 + $0x10] sm:$0xff] }
   0x6   :  { %305 = vmatpush3.xpose.msk.msra.mxu0 %vm36_vm0, %v27_v2  ;;  %323 = vmatprep.mubr.msk.f32.mxu1 %vm163_vm2, %v135_v10  ;;  %v139_v12 = vld [vmem:[%s453_s4] sm:$0xff]  ;;  %v138_v23 = vld [vmem:[%s452_s3 + $0x18] sm:$0xff] }
   0x7   :  { %306 = vmatprep.subr.mxu0 %v336_v0  ;;  %145 = vperm.xlu0 %332, %v139_v12   ;;  %v273_v16 = vld [vmem:[%s454_s2] ss:$0 sm:$0xff] }
   0x8   :  { %160 = vperm.xlu1 %333, %v142_v15  }
   0xa   :  { %307 = vmatpush3.xpose.msk.msra.mxu0 %vm36_vm0, %v26_v3 }
   0xb   :  { %308 = vmatprep.subr.mxu0 %v336_v0  ;;  %150 = vperm.xlu0 %332, %v140_v14  }
   0xe   :  { %309 = vmatpush3.xpose.msk.msra.mxu0 %vm36_vm0, %v25_v4 }
   0xf   :  { %310 = vmatprep.subr.mxu0 %v336_v0 }
  0x12   :  { %311 = vmatpush3.xpose.msk.msra.mxu0 %vm36_vm0, %v24_v5 }
  0x13   :  { %312 = vmatprep.subr.mxu0 %v336_v0 }
  0x16   :  { %313 = vmatpush3.xpose.msk.msra.mxu0 %vm36_vm0, %v23_v6 }
  0x17   :  { %314 = vmatprep.subr.mxu0 %v336_v0 }
  0x1a   :  { %315 = vmatpush3.xpose.msk.msra.mxu0 %vm36_vm0, %v22_v7 }
  0x1b   :  { %316 = vmatprep.subr.mxu0 %v336_v0 }
  0x1e   :  { %317 = vmatpush3.xpose.msk.msra.mxu0 %vm36_vm0, %v21_v8 }
  0x21   :  { %319 = vmatmul.mubr.msk.f32.vlgmr.msra.gmra.mxu0 %vm36_vm0, %v20_v9 }
  0x7f   :  { %v156_v25 = vpop.permute.xlu1 %155 }
  0x82   :  { %v146_v24 = vpop.permute.xlu0 %145 }
  0x83   :  { %v161_v31 = vpop.permute.xlu1 %160 }
  0x86   :  { %v151_v26 = vpop.permute.xlu0 %150 }
  0xe1   :  { %v130_v17 = vpop.f32.mrf.mxu0 }
  0xe2   :  { %v131_v18 = vadd.f32 %v273_v16, %v130_v17 }
  0xe3   :  { %v320_v19 = vpop.f32.mrf.mxu0 }
  0xe4   :  { %334 = vtanh.f32 %v131_v18 }
  0xf1   :  { %v335_v20 = vpop.eup %334 }
  0xf2   :  { %321 = vmatprep.subr.msk.mxu1 %vm163_vm2, %v335_v20 }
  0xf3   :  { %322 = vmatpush3.xpose.msk.msra.mxu1 %vm163_vm2, %v335_v20 }
  0xf6   :  { %324 = vmatmul.mubr.msk.f32.vlgmr.msra.gmra.mxu1 %vm163_vm2, %v136_v21 }
  0xf7   :  { %326 = vmatprep.mubr.msk.f32.mxu1 %vm163_vm2, %v137_v22 }
  0xfa   :  { %327 = vmatmul.mubr.msk.f32.gmra.mxu1 %vm163_vm2, %v138_v23 }
 0x1b6   :  { %v325_v27 = vpop.f32.mrf.mxu1 }
 0x1b7   :  { %v251_v28 = vadd.f32 %v325_v27, %v151_v26 }
 0x1b8   :  { %v245_v29 = vpop.f32.mrf.mxu1 }
 0x1b9   :  { %266 = vst.msk [vmem:[%s455_s5 + $0x8] sm:$0xff] %vm264_vm3, %v251_v28  ;;  %v246_v30 = vadd.f32 %v245_v29, %v146_v24 }
 0x1ba   :  { %v328_v32 = vpop.f32.mrf.mxu1 }
 0x1bb   :  { %265 = vst.msk [vmem:[%s455_s5] sm:$0xff] %vm264_vm3, %v246_v30  ;;  %v261_v33 = vadd.f32 %v328_v32, %v161_v31 }
 0x1bc   :  { %v255_v34 = vpop.f32.mrf.mxu1 }
 0x1bd   :  { %268 = vst.msk [vmem:[%s455_s5 + $0x18] sm:$0xff] %vm264_vm3, %v261_v33  ;;  %v256_v35 = vadd.f32 %v255_v34, %v156_v25 }
 0x1bf   :  { %267 = vst.msk [vmem:[%s455_s5 + $0x10] sm:$0xff] %vm264_vm3, %v256_v35 }

</bundles_post_ra>
